<compile_context>
chip_gen: v7x
topology: tpu7x:2x2x1
jax: 0.10.0
libtpu: 0.0.40
codegen_flags: <defaults>
</compile_context>

<pallas_src>
import jax
import jax.numpy as jnp
from jax.experimental import pallas as pl
from jax.experimental.pallas import tpu as pltpu


def _prod(dims):
    p = 1
    for d in dims:
        p *= int(d)
    return p


def _copy_kernel(x_ref, o_ref):
    # Identity copy of the current (row_tile, lanes) tile.
    o_ref[...] = x_ref[...]


def unflatten(x, new_shape):
    """Default / fast path: exactly torch's x.view(B, *new_shape).

    A view is metadata-only on a contiguous row-major array, so no kernel is
    launched and no HBM traffic is generated.
    """
    b = x.shape[0]
    feat = _prod(x.shape[1:])
    assert feat == _prod(new_shape), f"cannot view {x.shape} as (B, {new_shape})"
    return x.reshape((b,) + tuple(new_shape))


def unflatten_pallas(x, new_shape, *, target_block_bytes=2 << 20, donate=True):
    """Pallas variant: tiled identity memcpy + metadata reshape.

    Semantically identical to `unflatten`; exists only so the data movement
    happens inside a Pallas kernel (e.g. for benchmarking parity).
    """
    b = x.shape[0]
    feat = _prod(x.shape[1:])
    assert feat == _prod(new_shape), f"cannot view {x.shape} as (B, {new_shape})"
    out_shape = (b,) + tuple(new_shape)

    total = b * feat
    itemsize = jnp.dtype(x.dtype).itemsize

    # Present the data as a lane-dense 2D slab (rows, lanes), lanes % 128 == 0.
    lanes = None
    for cand in (2048, 1024, 512, 256, 128):
        if total % cand == 0:
            lanes = cand
            break
    if lanes is None:
        # Not 128-divisible: a copy kernel would only emit masked partial
        # stores, and the op is metadata-only anyway — skip the copy.
        return x.reshape(out_shape)

    rows = total // lanes

    # ~target_block_bytes per tile; double-buffered in+out => ~4x this in VMEM,
    # safe on every generation (v5e 16 MiB scoped default, v7x 64 MiB VMEM).
    row_tile = max(1, target_block_bytes // (lanes * itemsize))
    if row_tile >= rows:
        row_tile = rows                      # full-dim block (exempt from 8|rows rule)
    else:
        row_tile = max(32, (row_tile // 32) * 32)   # sublane-aligned for any dtype
        row_tile = min(row_tile, rows)

    x_flat = x.reshape(rows, lanes)          # metadata only (row-major)
    grid = (pl.cdiv(rows, row_tile),)

    out_flat = pl.pallas_call(
        _copy_kernel,
        out_shape=jax.ShapeDtypeStruct((rows, lanes), x.dtype),
        grid=grid,
        in_specs=[pl.BlockSpec((row_tile, lanes), lambda i: (i, 0))],
        out_specs=pl.BlockSpec((row_tile, lanes), lambda i: (i, 0)),
        # Identity copy: let XLA reuse the input HBM buffer for the output.
        input_output_aliases={0: 0} if donate else {},
        cost_estimate=pl.CostEstimate(
            flops=0,
            transcendentals=0,
            bytes_accessed=2 * total * itemsize,
        ),
        compiler_params=pltpu.CompilerParams(
            dimension_semantics=("parallel",),   # no cross-tile dependency
        ),
    )(x_flat)

    return out_flat.reshape(out_shape)       # metadata only


if __name__ == "__main__":
    key = jax.random.PRNGKey(0)

    # Frame-CNN style use: flattened conv features (B, C*H*W) -> NCHW.
    B, C, H, W = 2, 4, 16, 16
    x = jax.random.normal(key, (B, C * H * W), dtype=jnp.float32)

    # Fast (metadata-only) path — the recommended default.
    y_fast = unflatten(x, (C, H, W))

    # Pallas path — run the kernel once and block on it.
    y = unflatten_pallas(x, (C, H, W))
    y = jax.block_until_ready(y)

    ref = x.reshape(B, C, H, W)
    assert y.shape == (B, C, H, W), y.shape
    assert y.dtype == x.dtype
    assert bool(jnp.all(y == ref))
    assert bool(jnp.all(y_fast == ref))

    # Second, slightly larger case that exercises the multi-tile pipelined
    # path (grid > 1, partial trailing block) while staying small (~640 KiB).
    B2, C2, H2, W2 = 5, 8, 32, 128
    x2 = jax.random.normal(jax.random.PRNGKey(0), (B2, C2 * H2 * W2),
                           dtype=jnp.float32)
    y2 = unflatten_pallas(x2, (C2, H2, W2), target_block_bytes=64 * 1024)
    y2 = jax.block_until_ready(y2)
    assert y2.shape == (B2, C2, H2, W2)
    assert bool(jnp.all(y2 == x2.reshape(B2, C2, H2, W2)))

    print("KERNEL_OK")
</pallas_src>

<mosaic_0001>
module attributes {stable_mosaic.version = 11 : i64} {
  func.func @_copy_kernel(%arg0: i32, %arg1: memref<1x2048xf32, #tpu.memory_space<vmem>>, %arg2: memref<1x2048xf32, #tpu.memory_space<vmem>>) attributes {dimension_semantics = [#tpu.dimension_semantics<parallel>], iteration_bounds = array<i64: 1>, scalar_prefetch = 0 : i64, scratch_operands = 0 : i64, tpu.core_type = #tpu.core_type<tc>, window_params = [{transform_indices = @transform_0, window_bounds = array<i64: 1, 2048>}, {transform_indices = @transform_1, window_bounds = array<i64: 1, 2048>}]} {
    %c0 = arith.constant 0 : index
    %c0_0 = arith.constant 0 : index
    %0 = vector.load %arg1[%c0, %c0_0] : memref<1x2048xf32, #tpu.memory_space<vmem>>, vector<1x2048xf32>
    %c0_1 = arith.constant 0 : index
    %c0_2 = arith.constant 0 : index
    %1 = vector.load %arg2[%c0_1, %c0_2] : memref<1x2048xf32, #tpu.memory_space<vmem>>, vector<1x2048xf32>
    tpu.vector_store %arg2[%c0_1, %c0_2], %0 {strides = array<i32>} : memref<1x2048xf32, #tpu.memory_space<vmem>>, vector<1x2048xf32>,
    return
  }
  func.func @transform_0(%arg0: i32) -> (i32, i32) {
    %c0_i32 = arith.constant 0 : i32
    %c0_i32_0 = arith.constant 0 : i32
    return %arg0, %c0_i32 : i32, i32
  }
  func.func @transform_1(%arg0: i32) -> (i32, i32) {
    %c0_i32 = arith.constant 0 : i32
    %c0_i32_0 = arith.constant 0 : i32
    return %arg0, %c0_i32 : i32, i32
  }
}

</mosaic_0001>

<bundles_post_ra>
// kernel: tpu_custom_call.1
= control target key start
LH: loop header
LB: loop body
LE: loop exit
PB: predicated region body
PF: predicated region fallthrough
CT: control target
= control target key end

     0   :  { %6 = vsyncpa [#allocation3], 0  ;;  %s126_s0 = inlined_call_operand.hbm [shape: f32[1,2048], index: 0, kind: input, shape index: {}, may-alias: {0,1}]   ;;  %s127_s1 = inlined_call_operand.hbm [shape: f32[1,2048], index: 1, kind: output, shape index: {}, may-alias: {0,1}]  }
   0x1   :  { %7 = vsyncpa [#allocation4], 0  ;;  %s90_s6 = smov [#allocation2]   ;;  %s42_s10 = scalar_lea.hbm %s126_s0, 256 }
   0x2   :  { %s14_s7 = sshll.u32 %s90_s6, 4  ;;  %p43_p0 = scmp.ne.s32.totalorder %s126_s0, %s42_s10  ;;  %s15_s7 = int_to_ptr.vmem [resolvable:$true] %s14_s7 }
   0x3   :  { %p46_p1 = scmp.lt.u32.totalorder %s42_s10, %s126_s0 }
   0x5   :  { %p48_p2 = pnand %p46_p1, %p43_p0 }
   0x7   :  { %51 = shalt.err (!%p48_p2)
}
   0x8   :  { %s52_s15 = scalar_lea.vmem %s15_s7, 256  ;;  %p57_p4 = scmp.lt.s32.totalorder %s15_s7, %s15_s7 }
   0x9   :  { %p53_p3 = scmp.ne.s32.totalorder %s15_s7, %s52_s15  ;;  %p58_p5 = scmp.lt.s32.totalorder %s52_s15, %s52_s15 }
   0xb   :  { %p59_p6 = por %p58_p5, %p57_p4 }
   0xd   :  { %p60_p7 = pnand %p59_p6, %p53_p3 }
   0xf   :  { %63 = shalt.err (!%p60_p7)
}
  0x10   :  { %17 = dma.hbm_to_vmem [thread:$0]  %s126_s0, 256, %s15_s7, [#allocation3]  }
  0x11   :  { %86 = dma.done.wait [#allocation3], 256  }
  0x12   :  { %87 = vsyncadd [#allocation3], 4294967040  ;;  %s91_s18 = smov [#allocation5]   ;;  %v21_v0 = vld [vmem:[#allocation2] sm:$0xff]  ;;  %v22_v1 = vld [vmem:[#allocation2 + $0x8] sm:$0xff] }
  0x13   :  { %s31_s19 = sshll.u32 %s91_s18, 4  ;;  %23 = vst [vmem:[#allocation5] sm:$0xff] %v21_v0  ;;  %24 = vst [vmem:[#allocation5 + $0x8] sm:$0xff] %v22_v1  ;;  %s32_s19 = int_to_ptr.vmem [resolvable:$true] %s31_s19 }
  0x14   :  { %s64_s20 = scalar_lea.vmem %s32_s19, 256  ;;  %p69_p9 = scmp.lt.s32.totalorder %s32_s19, %s32_s19 }
  0x15   :  { %p65_p8 = scmp.ne.s32.totalorder %s32_s19, %s64_s20  ;;  %p70_p10 = scmp.lt.s32.totalorder %s64_s20, %s64_s20 }
  0x17   :  { %p71_p11 = por %p70_p10, %p69_p9 }
  0x19   :  { %p72_p12 = pnand %p71_p11, %p65_p8 }
  0x1b   :  { %75 = shalt.err (!%p72_p12)
}
  0x1c   :  { %s76_s0 = scalar_lea.hbm %s127_s1, 256 }
  0x1d   :  { %p77_p13 = scmp.ne.s32.totalorder %s127_s1, %s76_s0  ;;  %p80_p0 = scmp.lt.u32.totalorder %s76_s0, %s127_s1 }
  0x1f   :  { %p82_p1 = pnand %p80_p0, %p77_p13 }
  0x21   :  { %85 = shalt.err (!%p82_p1)
}
  0x22   :  { %34 = dma.vmem_to_hbm [thread:$0]  %s32_s19, 256, %s127_s1, [#allocation4]  }
  0x23   :  { %88 = dma.done.wait [#allocation4], 256  }
  0x24   :  { %89 = vsyncadd [#allocation4], 4294967040 }
  0x25   :  { %38 = vsyncpa [#allocation3], 1 }
  0x26   :  { %39 = vsyncpa [#allocation4], 1 }

</bundles_post_ra>
